<compile_context>
chip_gen: v7x
topology: tpu7x:2x2x1
jax: 0.10.0
libtpu: 0.0.40
codegen_flags: <defaults>
</compile_context>

<pallas_src>
import jax
import jax.numpy as jnp
from jax.experimental import pallas as pl
from jax.experimental.pallas import tpu as pltpu

BOX_EMB_SIZE = 64


def _round_up(n, m):
    return ((n + m - 1) // m) * m


def _lane_pad(n):
    return _round_up(max(int(n), 1), 128)


def _linear_head_kernel(x_ref, box_ref, wx_ref, wb_ref, b_ref, out_ref):
    # Two bf16 MXU passes (K=input_dim and K=box_dim), f32 accumulation,
    # f32 bias + sigmoid epilogue, bf16 store.  MXU/VPU/EUP all have huge
    # slack here; the kernel is HBM-read-bound on x.
    acc = jnp.dot(
        x_ref[...].astype(jnp.bfloat16), wx_ref[...],
        preferred_element_type=jnp.float32,
    )
    acc = acc + jnp.dot(
        box_ref[...].astype(jnp.bfloat16), wb_ref[...],
        preferred_element_type=jnp.float32,
    )
    acc = acc + b_ref[...]
    out_ref[...] = jax.nn.sigmoid(acc).astype(out_ref.dtype)


def fold_params(params):
    """Collapse box_embedding -> dense -> (+box_embed) -> feed_forward into one
    affine map split into an x-part and a box-part.  Exact in f32 (everything
    before the sigmoid is linear).  Call once (outside the per-forward path)."""
    eye = jnp.eye(BOX_EMB_SIZE, dtype=jnp.float32)
    w_db_i = params["w_db"] + eye                               # (64, 64)
    w_x = params["w_dx"] @ params["w_ff"]                       # (input_dim, out)
    w_box = params["w_be"] @ w_db_i @ params["w_ff"]            # (box_dim, out)
    b = (params["b_be"] @ w_db_i + params["b_d"]) @ params["w_ff"] + params["b_ff"]
    return {
        "w_x": w_x.astype(jnp.bfloat16),
        "w_box": w_box.astype(jnp.bfloat16),
        "b": b.astype(jnp.float32),                             # (1, out)
    }


def _vmem_block_bytes(tm, input_dim, box_dim, output_dim):
    # Double-buffered, lane-padded VMEM footprint of the streamed blocks.
    return (
        2 * tm * _lane_pad(input_dim) * 4      # x tile, f32
        + 2 * tm * _lane_pad(box_dim) * 4      # box tile, f32
        + 2 * tm * _lane_pad(output_dim) * 2   # out tile, bf16
    )


def linear_head_forward(x, box, folded, *, tm=8192):
    """x: (B, S, input_dim), box: (B, S, box_dim) -> (wh, xy, None, None, None)."""
    B, S, input_dim = x.shape
    box_dim = box.shape[-1]
    output_dim = folded["w_x"].shape[-1]
    M = B * S

    x2 = x.reshape(M, input_dim)          # view-style reshape, no HBM pass
    box2 = box.reshape(M, box_dim)

    # --- M tile selection -------------------------------------------------
    # Multiple of 16 (bf16 sublane pair); keep >=4 grid steps when M allows so
    # v7x's two TensorCores both get work (no-op on single-TC v5e/v6e).
    TM = min(int(tm), _round_up(pl.cdiv(M, 4), 16))
    TM = max(16, min(TM, _round_up(M, 16)))
    # Respect lane-padded VMEM budget (headroom under v7x's 64 MiB physical).
    VMEM_BUDGET = 40 * 1024 * 1024
    while TM > 16 and _vmem_block_bytes(TM, input_dim, box_dim, output_dim) > VMEM_BUDGET:
        TM = _round_up(TM // 2, 16)
    grid = (pl.cdiv(M, TM),)

    cost = pl.CostEstimate(
        flops=2 * M * (input_dim + box_dim) * output_dim,
        transcendentals=M * output_dim,
        bytes_accessed=(
            M * input_dim * 4                       # f32 x read
            + M * box_dim * 4                       # f32 box read
            + (input_dim + box_dim) * output_dim * 2  # bf16 folded weights
            + output_dim * 4                        # f32 bias
            + M * output_dim * 2                    # bf16 output write
        ),
    )

    out = pl.pallas_call(
        _linear_head_kernel,
        out_shape=jax.ShapeDtypeStruct((M, output_dim), jnp.bfloat16),
        grid=grid,
        in_specs=[
            pl.BlockSpec((TM, input_dim), lambda i: (i, 0)),          # streamed x
            pl.BlockSpec((TM, box_dim), lambda i: (i, 0)),            # streamed box
            pl.BlockSpec((input_dim, output_dim), lambda i: (0, 0)),  # resident w_x
            pl.BlockSpec((box_dim, output_dim), lambda i: (0, 0)),    # resident w_box
            pl.BlockSpec((1, output_dim), lambda i: (0, 0)),          # resident bias
        ],
        out_specs=pl.BlockSpec((TM, output_dim), lambda i: (i, 0)),
        compiler_params=pltpu.CompilerParams(
            dimension_semantics=("parallel",),        # shard M across TCs (v7x)
            vmem_limit_bytes=48 * 1024 * 1024,        # headroom over 40 MiB budget
        ),
        cost_estimate=cost,
    )(x2, box2, folded["w_x"], folded["w_box"], folded["b"])

    out = out.reshape(B, S, output_dim)
    xy = out[:, :, :2]
    wh = out[:, :, 2:]
    return (wh, xy, None, None, None)


def init_params(key, input_dim, box_dim, output_dim):
    """Deterministic params mimicking nn.Linear default init (uniform +-1/sqrt(fan_in)).
    Weights stored already-transposed: (in_features, out_features)."""
    ks = jax.random.split(key, 6)

    def uni(k, shape, fan_in):
        bound = 1.0 / jnp.sqrt(fan_in)
        return jax.random.uniform(k, shape, jnp.float32, -bound, bound)

    w_be = uni(ks[0], (box_dim, BOX_EMB_SIZE), box_dim)
    b_be = uni(ks[1], (1, BOX_EMB_SIZE), box_dim)

    dense_in = input_dim + BOX_EMB_SIZE
    w_dense = uni(ks[2], (dense_in, BOX_EMB_SIZE), dense_in)
    b_d = uni(ks[3], (1, BOX_EMB_SIZE), dense_in)

    w_ff = uni(ks[4], (BOX_EMB_SIZE, output_dim), BOX_EMB_SIZE)
    b_ff = uni(ks[5], (1, output_dim), BOX_EMB_SIZE)

    return {
        "w_be": w_be,
        "b_be": b_be,
        "w_dx": w_dense[:input_dim],     # dense weight applied to x
        "w_db": w_dense[input_dim:],     # dense weight applied to box_embed
        "b_d": b_d,
        "w_ff": w_ff,
        "b_ff": b_ff,
        "w_dense_full": w_dense,         # kept for the pure-JAX reference check
    }


def _reference(x, box, params):
    """Pure-JAX f32 reference of the PyTorch forward (unfolded)."""
    box_embed = box @ params["w_be"] + params["b_be"][0]
    cat = jnp.concatenate([x, box_embed], axis=-1)
    dense = cat @ params["w_dense_full"] + params["b_d"][0]
    out = jax.nn.sigmoid((dense + box_embed) @ params["w_ff"] + params["b_ff"][0])
    return out[:, :, 2:], out[:, :, :2]


if __name__ == "__main__":
    # Small shapes consistent with the module: x (B, S, input_dim), box (B, S, box_dim)
    B, S = 2, 8
    input_dim, box_dim, output_dim = 32, 4, 4

    key = jax.random.PRNGKey(0)
    kx, kb, kp = jax.random.split(key, 3)

    x = jax.random.normal(kx, (B, S, input_dim), jnp.float32)
    box = jax.random.normal(kb, (B, S, box_dim), jnp.float32)
    params = init_params(kp, input_dim, box_dim, output_dim)

    # Fold the affine chain once (hoisted out of the per-call path).
    folded = fold_params(params)

    wh, xy, _, _, _ = linear_head_forward(x, box, folded)
    wh = jax.block_until_ready(wh)
    xy = jax.block_until_ready(xy)

    wh_ref, xy_ref = _reference(x, box, params)
    assert wh.shape == (B, S, output_dim - 2) and xy.shape == (B, S, 2)
    # bf16 matmul operands + bf16 sigmoid output in [0, 1] -> absolute tolerance.
    wh_f = wh.astype(jnp.float32)
    xy_f = xy.astype(jnp.float32)
    assert jnp.allclose(wh_f, wh_ref, atol=2e-2), float(jnp.max(jnp.abs(wh_f - wh_ref)))
    assert jnp.allclose(xy_f, xy_ref, atol=2e-2), float(jnp.max(jnp.abs(xy_f - xy_ref)))

    print("KERNEL_OK")
</pallas_src>

<mosaic_0001>
module attributes {stable_mosaic.version = 11 : i64} {
  func.func @_linear_head_kernel(%arg0: i32, %arg1: memref<16x32xf32, #tpu.memory_space<vmem>>, %arg2: memref<16x4xf32, #tpu.memory_space<vmem>>, %arg3: memref<32x4xbf16, #tpu.memory_space<vmem>>, %arg4: memref<4x4xbf16, #tpu.memory_space<vmem>>, %arg5: memref<1x4xf32, #tpu.memory_space<vmem>>, %arg6: memref<16x4xbf16, #tpu.memory_space<vmem>>) attributes {dimension_semantics = [#tpu.dimension_semantics<parallel>], iteration_bounds = array<i64: 1>, scalar_prefetch = 0 : i64, scratch_operands = 0 : i64, tpu.core_type = #tpu.core_type<tc>, window_params = [{transform_indices = @transform_0, window_bounds = array<i64: 16, 32>}, {transform_indices = @transform_1, window_bounds = array<i64: 16, 4>}, {pipeline_mode = #tpu.pipeline_mode<synchronous>, transform_indices = @transform_2, window_bounds = array<i64: 32, 4>}, {pipeline_mode = #tpu.pipeline_mode<synchronous>, transform_indices = @transform_3, window_bounds = array<i64: 4, 4>}, {pipeline_mode = #tpu.pipeline_mode<synchronous>, transform_indices = @transform_4, window_bounds = array<i64: 1, 4>}, {transform_indices = @transform_5, window_bounds = array<i64: 16, 4>}]} {
    %c0 = arith.constant 0 : index
    %c0_0 = arith.constant 0 : index
    %0 = vector.load %arg1[%c0, %c0_0] : memref<16x32xf32, #tpu.memory_space<vmem>>, vector<16x32xf32>
    %1 = arith.truncf %0 : vector<16x32xf32> to vector<16x32xbf16>
    %c0_1 = arith.constant 0 : index
    %c0_2 = arith.constant 0 : index
    %2 = vector.load %arg3[%c0_1, %c0_2] : memref<32x4xbf16, #tpu.memory_space<vmem>>, vector<32x4xbf16>
    %cst = arith.constant dense<0.000000e+00> : vector<16x4xf32>
    %3 = tpu.matmul %1, %2, %cst {dimension_numbers = #tpu.dot_dimension_numbers<[1], [0], [0], [1], [0, 0, 1, 1], [], []>} : vector<16x32xbf16>, vector<32x4xbf16>, vector<16x4xf32> -> vector<16x4xf32>
    %c0_3 = arith.constant 0 : index
    %c0_4 = arith.constant 0 : index
    %4 = vector.load %arg2[%c0_3, %c0_4] : memref<16x4xf32, #tpu.memory_space<vmem>>, vector<16x4xf32>
    %5 = arith.truncf %4 : vector<16x4xf32> to vector<16x4xbf16>
    %c0_5 = arith.constant 0 : index
    %c0_6 = arith.constant 0 : index
    %6 = vector.load %arg4[%c0_5, %c0_6] : memref<4x4xbf16, #tpu.memory_space<vmem>>, vector<4x4xbf16>
    %cst_7 = arith.constant dense<0.000000e+00> : vector<16x4xf32>
    %7 = tpu.matmul %5, %6, %cst_7 {dimension_numbers = #tpu.dot_dimension_numbers<[1], [0], [0], [1], [0, 0, 1, 1], [], []>} : vector<16x4xbf16>, vector<4x4xbf16>, vector<16x4xf32> -> vector<16x4xf32>
    %8 = arith.addf %3, %7 : vector<16x4xf32>
    %c0_8 = arith.constant 0 : index
    %c0_9 = arith.constant 0 : index
    %9 = vector.load %arg5[%c0_8, %c0_9] : memref<1x4xf32, #tpu.memory_space<vmem>>, vector<1x4xf32>
    %10 = vector.broadcast %9 : vector<1x4xf32> to vector<16x4xf32>
    %11 = arith.addf %8, %10 : vector<16x4xf32>
    %12 = arith.negf %11 : vector<16x4xf32>
    %13 = math.exp %12 : vector<16x4xf32>
    %cst_10 = arith.constant 1.000000e+00 : f32
    %14 = vector.broadcast %cst_10 : f32 to vector<16x4xf32>
    %15 = arith.addf %14, %13 : vector<16x4xf32>
    %16 = arith.divf %14, %15 : vector<16x4xf32>
    %17 = arith.truncf %16 : vector<16x4xf32> to vector<16x4xbf16>
    %c0_11 = arith.constant 0 : index
    %c0_12 = arith.constant 0 : index
    %18 = vector.load %arg6[%c0_11, %c0_12] : memref<16x4xbf16, #tpu.memory_space<vmem>>, vector<16x4xbf16>
    tpu.vector_store %arg6[%c0_11, %c0_12], %17 {strides = array<i32>} : memref<16x4xbf16, #tpu.memory_space<vmem>>, vector<16x4xbf16>,
    return
  }
  func.func @transform_0(%arg0: i32) -> (i32, i32) {
    %c0_i32 = arith.constant 0 : i32
    %c0_i32_0 = arith.constant 0 : i32
    return %arg0, %c0_i32 : i32, i32
  }
  func.func @transform_1(%arg0: i32) -> (i32, i32) {
    %c0_i32 = arith.constant 0 : i32
    %c0_i32_0 = arith.constant 0 : i32
    return %arg0, %c0_i32 : i32, i32
  }
  func.func @transform_2(%arg0: i32) -> (i32, i32) {
    %c0_i32 = arith.constant 0 : i32
    %c0_i32_0 = arith.constant 0 : i32
    %c0_i32_1 = arith.constant 0 : i32
    return %c0_i32, %c0_i32_0 : i32, i32
  }
  func.func @transform_3(%arg0: i32) -> (i32, i32) {
    %c0_i32 = arith.constant 0 : i32
    %c0_i32_0 = arith.constant 0 : i32
    %c0_i32_1 = arith.constant 0 : i32
    return %c0_i32, %c0_i32_0 : i32, i32
  }
  func.func @transform_4(%arg0: i32) -> (i32, i32) {
    %c0_i32 = arith.constant 0 : i32
    %c0_i32_0 = arith.constant 0 : i32
    %c0_i32_1 = arith.constant 0 : i32
    return %c0_i32, %c0_i32_0 : i32, i32
  }
  func.func @transform_5(%arg0: i32) -> (i32, i32) {
    %c0_i32 = arith.constant 0 : i32
    %c0_i32_0 = arith.constant 0 : i32
    return %arg0, %c0_i32 : i32, i32
  }
}

</mosaic_0001>

<bundles_post_ra>
// kernel: tpu_custom_call.1
= control target key start
LH: loop header
LB: loop body
LE: loop exit
PB: predicated region body
PF: predicated region fallthrough
CT: control target
= control target key end

     0   :  { %vm36_vm0 = vcmask 1041408   ;;  %v216_v0 = vmov 0.0   ;;  %vm217_vm1 = vmmov 0   ;;  %vm32_vm2 = vcmask 31744   ;;  %s278_s2 = inlined_call_operand.vmem [shape: bf16[32,4], index: 2, kind: input, shape index: {}]   ;;  %s279_s3 = inlined_call_operand.vmem [shape: bf16[4,4], index: 3, kind: input, shape index: {}]   ;;  %s280_s1 = inlined_call_operand.vmem [shape: f32[16,4], index: 1, kind: input, shape index: {}]   ;;  %s281_s0 = inlined_call_operand.vmem [shape: f32[16,32], index: 0, kind: input, shape index: {}]   ;;  %s282_s4 = inlined_call_operand.vmem [shape: f32[1,4], index: 4, kind: input, shape index: {}]   ;;  %s283_s5 = inlined_call_operand.vmem [shape: bf16[16,4], index: 5, kind: output, shape index: {}]  }
   0x1   :  { %196 = vmatprep.subr.bf16.mxu1 %v216_v0  ;;  %190 = vmatprep.subr.bf16.mxu0 %v216_v0  ;;  %v206_v1 = vld [vmem:[%s278_s2] sm:$0xff]   ;;  %v29_v4 = vld [vmem:[%s280_s1 + $0x8] sm:$0xff]  ;;  %vm93_vm3 = vcmask 261120   ;;  %vm167_vm4 = vcmask 27648  }
   0x2   :  { %v31_v2 = vld [vmem:[%s279_s3] sm:$0x3]  ;;  %192 = vmatprep.mubr.msk.bf16.mxu0 %vm217_vm1, %v216_v0  ;;  %200 = vmatprep.mubr.msk.bf16.mxu1 %vm217_vm1, %v216_v0  ;;  %v207_v7 = vld [vmem:[%s278_s2 + $0x8] sm:$0xff]  }
   0x3   :  { %v28_v3 = vld [vmem:[%s280_s1] sm:$0xff]  ;;  %197 = vmatpush3.bf16.msra.mxu1 %v206_v1  ;;  %v38_v5 = vsel %vm36_vm0, %v31_v2, 0  ;;  %v22_v9 = vld [vmem:[%s281_s0 + $0x8] sm:$0xff] }
   0x4   :  { %v30_v6 = vpack.c.bf16 %v29_v4, %v28_v3  ;;  %191 = vmatpush3.bf16.msra.mxu0 %v38_v5  ;;  %198 = vmatprep.subr.bf16.mxu1 %v216_v0  ;;  %v21_v8 = vld [vmem:[%s281_s0] sm:$0xff] }
   0x5   :  { %v23_v10 = vpack.c.bf16 %v22_v9, %v21_v8  ;;  %v178_v16 = vld [vmem:[%s282_s4] ss:$0 sm:$0xff] }
   0x7   :  { %193 = vmatmul.mubr.msk.bf16.vlgmr.msra.gmra.mrb[0].mxu0 %vm32_vm2, %v30_v6  ;;  %199 = vmatpush3.bf16.msra.mxu1 %v207_v7 }
   0xa   :  { %201 = vmatmul.mubr.msk.bf16.vlgmr.msra.gmra.mrb[0].mxu1 %vm93_vm3, %v23_v10 }
  0xda   :  { %v74_v11 = vpop.f32.mrb[0].mxu0 }
  0xdb   :  { %v194_v12 = vpop.f32.mrb[1].mxu0 }
  0xdc   :  { %v77_v13 = vpop.f32.mrb[2].mxu0 }
  0xdd   :  { %v195_v14 = vpop.f32.mrb[3].mxu0  ;;  %v131_v15 = vpop.f32.mrb[0].mxu1 }
  0xde   :  { %v132_v17 = vadd.f32 %v131_v15, %v74_v11  ;;  %v202_v18 = vpop.f32.mrb[1].mxu1 }
  0xdf   :  { %v134_v19 = vpop.f32.mrb[2].mxu1 }
  0xe0   :  { %v145_v20 = vadd.f32 %v178_v16, %v132_v17  ;;  %v135_v21 = vadd.f32 %v134_v19, %v77_v13  ;;  %v203_v22 = vpop.f32.mrb[3].mxu1 }
  0xe2   :  { %v179_v23 = vmul.f32 -1.442695, %v145_v20  ;;  %v146_v24 = vadd.f32 %v178_v16, %v135_v21 }
  0xe4   :  { %208 = vpow2.f32 %v179_v23  ;;  %v180_v25 = vmul.f32 -1.442695, %v146_v24 }
  0xe6   :  { %210 = vpow2.f32 %v180_v25 }
  0xee   :  { %v209_v26 = vpop.eup %208 }
  0xef   :  { %v153_v27 = vadd.f32 1.0, %v209_v26 }
  0xf0   :  { %v211_v28 = vpop.eup %210 }
  0xf1   :  { %212 = vrcp.f32 %v153_v27  ;;  %v154_v29 = vadd.f32 1.0, %v211_v28 }
  0xf3   :  { %214 = vrcp.f32 %v154_v29 }
  0xfb   :  { %v213_v30 = vpop.eup %212 }
  0xfc   :  { %v183_v31 = vpack.c.bf16 %v213_v30, %v213_v30 }
  0xfd   :  { %v215_v32 = vpop.eup %214 }
  0xfe   :  { %168 = vst.msk [vmem:[%s283_s5] sm:$0xf] %vm167_vm4, %v183_v31  ;;  %v184_v33 = vpack.c.bf16 %v215_v32, %v215_v32 }
 0x100   :  { %169 = vst.msk [vmem:[%s283_s5 + $0x4] sm:$0xf] %vm167_vm4, %v184_v33 }

</bundles_post_ra>
